<compile_context>
chip_gen: v5e
topology: v5e:2x2
jax: 0.10.0
libtpu: 0.0.40
codegen_flags: <defaults>
</compile_context>

<pallas_src>
import functools

import jax
import jax.numpy as jnp
from jax.experimental import pallas as pl
from jax.experimental.pallas import tpu as pltpu

LANE = 128
SUB = 8
EPS = 1e-5


def _pad_to(n, m):
    return ((n + m - 1) // m) * m


# ----------------------------- kernel ---------------------------------------


def mlp_kernel(
    x_ref,
    w1_ref, b1_ref,
    w2_ref, b2_ref,
    w3_ref, b3_ref,
    w4t_ref, b4t_ref,
    out_ref,
):
    # bf16 matmul inputs, f32 MXU accumulation, f32 elementwise epilogue.
    x = x_ref[...].astype(jnp.bfloat16)   # no-op if the wrapper already cast

    h = jnp.dot(x, w1_ref[...], preferred_element_type=jnp.float32) + b1_ref[...]
    h = jnp.maximum(h, 0.0)

    h = jnp.dot(h.astype(jnp.bfloat16), w2_ref[...],
                preferred_element_type=jnp.float32) + b2_ref[...]
    h = jnp.maximum(h, 0.0)

    h = jnp.dot(h.astype(jnp.bfloat16), w3_ref[...],
                preferred_element_type=jnp.float32) + b3_ref[...]
    h = jnp.maximum(h, 0.0)

    # Final Linear in transposed orientation: classes on sublanes (8, only 2
    # real), batch on lanes -> lane-dense (8, bt) writeback.  The transpose
    # uses the XLU slot, which is idle here.
    ht = jnp.transpose(h).astype(jnp.bfloat16)                  # (d3p, bt)
    out_t = jnp.dot(w4t_ref[...], ht,
                    preferred_element_type=jnp.float32) + b4t_ref[...]
    out_ref[...] = out_t.astype(out_ref.dtype)


# --------------------------- tiling / wrapper --------------------------------


def _choose_tiling(B, bt_max):
    """Pick (bt, Bp).

    bt is a multiple of 8; whenever more than one tile is used bt is a
    multiple of 128 so the transposed (8, bt) output block keeps a
    lane-aligned last dim.  Prefer >= 2 tiles (even count) so the 'parallel'
    batch axis shards across both v7x TensorCores.
    """
    if B <= LANE:
        Bp = _pad_to(B, SUB)
        return Bp, Bp                      # single full-width tile
    bt_cap = max(LANE, (bt_max // LANE) * LANE)
    Bp0 = _pad_to(B, LANE)
    half = _pad_to((Bp0 + 1) // 2, LANE)   # aim for >= 2 tiles
    bt = min(bt_cap, half)
    Bp = _pad_to(Bp0, bt)
    return bt, Bp


def _const_spec(shape):
    # Grid-invariant (replicated) block.  ~100 KiB total across all weights,
    # so default double-buffering is fine; on v7x at larger hidden dims add
    # pipeline_mode=pl.Buffered(1) here and set vmem_limit_bytes.
    return pl.BlockSpec(shape, lambda i: (0,) * len(shape))


@functools.partial(jax.jit, static_argnames=("bt_max",))
def mlp_forward(x, params, bt_max=512):
    """x: (B, input_dim) float32.  params: padded/folded kernel params."""
    B, Din = x.shape
    d0p = params["w1"].shape[0]
    d1p = params["w1"].shape[1]
    d2p = params["w2"].shape[1]
    d3p = params["w3"].shape[1]

    bt, Bp = _choose_tiling(B, bt_max)

    if (Bp, d0p) == (B, Din):
        # Already aligned: no wrapper-side copy, kernel casts to bf16 on-chip.
        xp = x
    else:
        # Fuse pad + bf16 cast into a single wrapper op (halves the x DMA).
        xp = (jnp.zeros((Bp, d0p), jnp.bfloat16)
              .at[:B, :Din].set(x.astype(jnp.bfloat16)))

    grid = (Bp // bt,)
    in_specs = [
        pl.BlockSpec((bt, d0p), lambda i: (i, 0)),   # x tile
        _const_spec((d0p, d1p)), _const_spec((1, d1p)),
        _const_spec((d1p, d2p)), _const_spec((1, d2p)),
        _const_spec((d2p, d3p)), _const_spec((1, d3p)),
        _const_spec((SUB, d3p)), _const_spec((SUB, 1)),
    ]
    # Transposed output slab: (8 classes-padded, Bp) f32, lane-dense per tile.
    out_spec = pl.BlockSpec((SUB, bt), lambda i: (0, i))

    out_t = pl.pallas_call(
        mlp_kernel,
        out_shape=jax.ShapeDtypeStruct((SUB, Bp), jnp.float32),
        grid_spec=pltpu.PrefetchScalarGridSpec(
            num_scalar_prefetch=0,
            grid=grid,
            in_specs=in_specs,
            out_specs=out_spec,
        ),
        compiler_params=pltpu.CompilerParams(
            dimension_semantics=("parallel",),   # batch tiles shard across TCs
        ),
    )(
        xp,
        params["w1"], params["b1"],
        params["w2"], params["b2"],
        params["w3"], params["b3"],
        params["w4t"], params["b4t"],
    )
    return out_t[:2, :B].T


# ------------------------ params (plain-JAX glue) ----------------------------


def init_raw_params(key, input_dim):
    """PyTorch-style init of MLPModel; BN running stats get non-trivial values
    so the eval-mode BN fold is actually exercised by the self-test."""
    l1 = int(input_dim * 1.5)
    l2 = int(l1 * 0.66)
    l3 = int(l2 * 0.5)
    dims = [input_dim, l1, l2, l3, 2]

    raw = {"dims": dims}
    keys = jax.random.split(key, 24)
    ki = 0
    for idx in range(4):
        din, dout = dims[idx], dims[idx + 1]
        bound = 1.0 / (float(din) ** 0.5)  # nn.Linear default U(-1/sqrt(fan_in), .)
        raw[f"w{idx + 1}"] = jax.random.uniform(
            keys[ki], (din, dout), jnp.float32, -bound, bound); ki += 1
        raw[f"b{idx + 1}"] = jax.random.uniform(
            keys[ki], (dout,), jnp.float32, -bound, bound); ki += 1
        if idx < 3:
            raw[f"gamma{idx + 1}"] = 1.0 + 0.1 * jax.random.normal(
                keys[ki], (dout,), jnp.float32); ki += 1
            raw[f"beta{idx + 1}"] = 0.1 * jax.random.normal(
                keys[ki], (dout,), jnp.float32); ki += 1
            raw[f"mean{idx + 1}"] = 0.1 * jax.random.normal(
                keys[ki], (dout,), jnp.float32); ki += 1
            raw[f"var{idx + 1}"] = jnp.abs(
                1.0 + 0.1 * jax.random.normal(keys[ki], (dout,), jnp.float32)); ki += 1
    return raw


def prepare_kernel_params(raw, eps=EPS):
    """Fold eval-mode BN into the next Linear, pad, cast weights to bf16.
    The final Linear is stored transposed (classes on sublanes) so the kernel
    can emit a lane-dense (8, bt) output slab."""
    dims = raw["dims"]
    scales, shifts = [], []
    for i in range(1, 4):
        s = raw[f"gamma{i}"] / jnp.sqrt(raw[f"var{i}"] + eps)
        t = raw[f"beta{i}"] - raw[f"mean{i}"] * s
        scales.append(s)
        shifts.append(t)

    params = {}
    for idx in range(4):
        din, dout = dims[idx], dims[idx + 1]
        w = raw[f"w{idx + 1}"]
        b = raw[f"b{idx + 1}"]
        if idx > 0:
            s, t = scales[idx - 1], shifts[idx - 1]
            b = t @ w + b                 # b' = t @ W + b   (uses original W)
            w = s[:, None] * w            # W' = diag(s) @ W
        # Layer-1 K dim only needs sublane-8 alignment; hidden lane / K dims
        # stay 128-padded (do NOT pad to 256 for v6e/v7x MXU fill).
        dinp = _pad_to(din, SUB) if idx == 0 else _pad_to(din, LANE)
        if idx < 3:
            doutp = _pad_to(dout, LANE)
            wp = jnp.zeros((dinp, doutp), jnp.float32).at[:din, :dout].set(w)
            bp = jnp.zeros((1, doutp), jnp.float32).at[0, :dout].set(b)
            params[f"w{idx + 1}"] = wp.astype(jnp.bfloat16)   # bf16 matmul weights
            params[f"b{idx + 1}"] = bp                        # f32 bias epilogue
        else:
            # Final layer, transposed: (8, d3p); only the first 2 rows are real.
            wtp = jnp.zeros((SUB, dinp), jnp.float32).at[:dout, :din].set(w.T)
            btp = jnp.zeros((SUB, 1), jnp.float32).at[:dout, 0].set(b)
            params["w4t"] = wtp.astype(jnp.bfloat16)
            params["b4t"] = btp
    return params


# ----------------------------- references ------------------------------------


def reference_forward_f32(x, raw, eps=EPS):
    """Unfolded, unpadded, f32 eval-mode forward (matches PyTorch module math)."""
    h = x
    for i in range(1, 4):
        h = h @ raw[f"w{i}"] + raw[f"b{i}"]
        h = jnp.maximum(h, 0.0)
        # Dropout = identity in eval mode.
        s = raw[f"gamma{i}"] / jnp.sqrt(raw[f"var{i}"] + eps)
        h = (h - raw[f"mean{i}"]) * s + raw[f"beta{i}"]
    return h @ raw["w4"] + raw["b4"]


def reference_forward_matched(x, params):
    """Pure-JAX forward with the exact padded/folded bf16 kernel params."""
    d0p = params["w1"].shape[0]
    h = (jnp.zeros((x.shape[0], d0p), jnp.float32)
         .at[:, : x.shape[1]].set(x))
    for i in range(1, 4):
        h = jnp.dot(h.astype(jnp.bfloat16), params[f"w{i}"],
                    preferred_element_type=jnp.float32) + params[f"b{i}"]
        h = jnp.maximum(h, 0.0)
    out_t = jnp.dot(params["w4t"], jnp.transpose(h).astype(jnp.bfloat16),
                    preferred_element_type=jnp.float32) + params["b4t"]
    return out_t[:2, :].T


# ------------------------------- self-test ------------------------------------


if __name__ == "__main__":
    input_dim = 32

    key = jax.random.PRNGKey(0)
    kp, kx1, kx2 = jax.random.split(key, 3)
    raw = init_raw_params(kp, input_dim)
    params = prepare_kernel_params(raw)

    # --- small batch: single tile, no wrapper-side padding ---
    x = jax.random.normal(kx1, (8, input_dim), jnp.float32)
    out = jax.block_until_ready(mlp_forward(x, params))
    assert out.shape == (8, 2), out.shape

    ref_exact = reference_forward_matched(x, params)
    assert jnp.allclose(out, ref_exact, atol=1e-3, rtol=1e-3), (
        float(jnp.max(jnp.abs(out - ref_exact))))
    ref_f32 = reference_forward_f32(x, raw)
    assert jnp.allclose(out, ref_f32, atol=5e-2, rtol=5e-2), (
        float(jnp.max(jnp.abs(out - ref_f32))))

    # --- larger batch: exercises padding + multi-tile (grid=(2,)) path ---
    x2 = jax.random.normal(kx2, (200, input_dim), jnp.float32)
    out2 = jax.block_until_ready(mlp_forward(x2, params))
    assert out2.shape == (200, 2), out2.shape

    ref2_exact = reference_forward_matched(x2, params)
    assert jnp.allclose(out2, ref2_exact, atol=1e-3, rtol=1e-3), (
        float(jnp.max(jnp.abs(out2 - ref2_exact))))
    ref2_f32 = reference_forward_f32(x2, raw)
    assert jnp.allclose(out2, ref2_f32, atol=5e-2, rtol=5e-2), (
        float(jnp.max(jnp.abs(out2 - ref2_f32))))

    print("KERNEL_OK")
</pallas_src>

<mosaic_0001>
module attributes {stable_mosaic.version = 11 : i64} {
  func.func @mlp_kernel(%arg0: i32, %arg1: memref<8x32xf32, #tpu.memory_space<vmem>>, %arg2: memref<32x128xbf16, #tpu.memory_space<vmem>>, %arg3: memref<1x128xf32, #tpu.memory_space<vmem>>, %arg4: memref<128x128xbf16, #tpu.memory_space<vmem>>, %arg5: memref<1x128xf32, #tpu.memory_space<vmem>>, %arg6: memref<128x128xbf16, #tpu.memory_space<vmem>>, %arg7: memref<1x128xf32, #tpu.memory_space<vmem>>, %arg8: memref<8x128xbf16, #tpu.memory_space<vmem>>, %arg9: memref<8x1xf32, #tpu.memory_space<vmem>>, %arg10: memref<8x8xf32, #tpu.memory_space<vmem>>) attributes {dimension_semantics = [#tpu.dimension_semantics<parallel>], iteration_bounds = array<i64: 1>, scalar_prefetch = 0 : i64, scratch_operands = 0 : i64, tpu.core_type = #tpu.core_type<tc>, window_params = [{transform_indices = @transform_0, window_bounds = array<i64: 8, 32>}, {pipeline_mode = #tpu.pipeline_mode<synchronous>, transform_indices = @transform_1, window_bounds = array<i64: 32, 128>}, {pipeline_mode = #tpu.pipeline_mode<synchronous>, transform_indices = @transform_2, window_bounds = array<i64: 1, 128>}, {pipeline_mode = #tpu.pipeline_mode<synchronous>, transform_indices = @transform_3, window_bounds = array<i64: 128, 128>}, {pipeline_mode = #tpu.pipeline_mode<synchronous>, transform_indices = @transform_4, window_bounds = array<i64: 1, 128>}, {pipeline_mode = #tpu.pipeline_mode<synchronous>, transform_indices = @transform_5, window_bounds = array<i64: 128, 128>}, {pipeline_mode = #tpu.pipeline_mode<synchronous>, transform_indices = @transform_6, window_bounds = array<i64: 1, 128>}, {pipeline_mode = #tpu.pipeline_mode<synchronous>, transform_indices = @transform_7, window_bounds = array<i64: 8, 128>}, {pipeline_mode = #tpu.pipeline_mode<synchronous>, transform_indices = @transform_8, window_bounds = array<i64: 8, 1>}, {transform_indices = @transform_9, window_bounds = array<i64: 8, 8>}]} {
    %c0 = arith.constant 0 : index
    %c0_0 = arith.constant 0 : index
    %0 = vector.load %arg1[%c0, %c0_0] : memref<8x32xf32, #tpu.memory_space<vmem>>, vector<8x32xf32>
    %1 = arith.truncf %0 : vector<8x32xf32> to vector<8x32xbf16>
    %c0_1 = arith.constant 0 : index
    %c0_2 = arith.constant 0 : index
    %2 = vector.load %arg2[%c0_1, %c0_2] : memref<32x128xbf16, #tpu.memory_space<vmem>>, vector<32x128xbf16>
    %cst = arith.constant dense<0.000000e+00> : vector<8x128xf32>
    %3 = tpu.matmul %1, %2, %cst {dimension_numbers = #tpu.dot_dimension_numbers<[1], [0], [0], [1], [0, 0, 1, 1], [], []>} : vector<8x32xbf16>, vector<32x128xbf16>, vector<8x128xf32> -> vector<8x128xf32>
    %c0_3 = arith.constant 0 : index
    %c0_4 = arith.constant 0 : index
    %4 = vector.load %arg3[%c0_3, %c0_4] : memref<1x128xf32, #tpu.memory_space<vmem>>, vector<1x128xf32>
    %5 = vector.broadcast %4 : vector<1x128xf32> to vector<8x128xf32>
    %6 = arith.addf %3, %5 : vector<8x128xf32>
    %cst_5 = arith.constant 0.000000e+00 : f32
    %7 = vector.broadcast %cst_5 : f32 to vector<8x128xf32>
    %8 = arith.maximumf %6, %7 : vector<8x128xf32>
    %9 = arith.truncf %8 : vector<8x128xf32> to vector<8x128xbf16>
    %c0_6 = arith.constant 0 : index
    %c0_7 = arith.constant 0 : index
    %10 = vector.load %arg4[%c0_6, %c0_7] : memref<128x128xbf16, #tpu.memory_space<vmem>>, vector<128x128xbf16>
    %cst_8 = arith.constant dense<0.000000e+00> : vector<8x128xf32>
    %11 = tpu.matmul %9, %10, %cst_8 {dimension_numbers = #tpu.dot_dimension_numbers<[1], [0], [0], [1], [0, 0, 1, 1], [], []>} : vector<8x128xbf16>, vector<128x128xbf16>, vector<8x128xf32> -> vector<8x128xf32>
    %c0_9 = arith.constant 0 : index
    %c0_10 = arith.constant 0 : index
    %12 = vector.load %arg5[%c0_9, %c0_10] : memref<1x128xf32, #tpu.memory_space<vmem>>, vector<1x128xf32>
    %13 = vector.broadcast %12 : vector<1x128xf32> to vector<8x128xf32>
    %14 = arith.addf %11, %13 : vector<8x128xf32>
    %cst_11 = arith.constant 0.000000e+00 : f32
    %15 = vector.broadcast %cst_11 : f32 to vector<8x128xf32>
    %16 = arith.maximumf %14, %15 : vector<8x128xf32>
    %17 = arith.truncf %16 : vector<8x128xf32> to vector<8x128xbf16>
    %c0_12 = arith.constant 0 : index
    %c0_13 = arith.constant 0 : index
    %18 = vector.load %arg6[%c0_12, %c0_13] : memref<128x128xbf16, #tpu.memory_space<vmem>>, vector<128x128xbf16>
    %cst_14 = arith.constant dense<0.000000e+00> : vector<8x128xf32>
    %19 = tpu.matmul %17, %18, %cst_14 {dimension_numbers = #tpu.dot_dimension_numbers<[1], [0], [0], [1], [0, 0, 1, 1], [], []>} : vector<8x128xbf16>, vector<128x128xbf16>, vector<8x128xf32> -> vector<8x128xf32>
    %c0_15 = arith.constant 0 : index
    %c0_16 = arith.constant 0 : index
    %20 = vector.load %arg7[%c0_15, %c0_16] : memref<1x128xf32, #tpu.memory_space<vmem>>, vector<1x128xf32>
    %21 = vector.broadcast %20 : vector<1x128xf32> to vector<8x128xf32>
    %22 = arith.addf %19, %21 : vector<8x128xf32>
    %cst_17 = arith.constant 0.000000e+00 : f32
    %23 = vector.broadcast %cst_17 : f32 to vector<8x128xf32>
    %24 = arith.maximumf %22, %23 : vector<8x128xf32>
    %25 = tpu.transpose %24, [1, 0] : vector<8x128xf32> -> vector<128x8xf32>
    %26 = arith.truncf %25 : vector<128x8xf32> to vector<128x8xbf16>
    %c0_18 = arith.constant 0 : index
    %c0_19 = arith.constant 0 : index
    %27 = vector.load %arg8[%c0_18, %c0_19] : memref<8x128xbf16, #tpu.memory_space<vmem>>, vector<8x128xbf16>
    %cst_20 = arith.constant dense<0.000000e+00> : vector<8x8xf32>
    %28 = tpu.matmul %27, %26, %cst_20 {dimension_numbers = #tpu.dot_dimension_numbers<[1], [0], [0], [1], [0, 0, 1, 1], [], []>} : vector<8x128xbf16>, vector<128x8xbf16>, vector<8x8xf32> -> vector<8x8xf32>
    %c0_21 = arith.constant 0 : index
    %c0_22 = arith.constant 0 : index
    %29 = vector.load %arg9[%c0_21, %c0_22] : memref<8x1xf32, #tpu.memory_space<vmem>>, vector<8x1xf32>
    %30 = vector.broadcast %29 : vector<8x1xf32> to vector<8x8xf32>
    %31 = arith.addf %28, %30 : vector<8x8xf32>
    %c0_23 = arith.constant 0 : index
    %c0_24 = arith.constant 0 : index
    %32 = vector.load %arg10[%c0_23, %c0_24] : memref<8x8xf32, #tpu.memory_space<vmem>>, vector<8x8xf32>
    tpu.vector_store %arg10[%c0_23, %c0_24], %31 {strides = array<i32>} : memref<8x8xf32, #tpu.memory_space<vmem>>, vector<8x8xf32>,
    return
  }
  func.func @transform_0(%arg0: i32) -> (i32, i32) {
    %c0_i32 = arith.constant 0 : i32
    %c0_i32_0 = arith.constant 0 : i32
    return %arg0, %c0_i32 : i32, i32
  }
  func.func @transform_1(%arg0: i32) -> (i32, i32) {
    %c0_i32 = arith.constant 0 : i32
    %c0_i32_0 = arith.constant 0 : i32
    %c0_i32_1 = arith.constant 0 : i32
    return %c0_i32, %c0_i32_0 : i32, i32
  }
  func.func @transform_2(%arg0: i32) -> (i32, i32) {
    %c0_i32 = arith.constant 0 : i32
    %c0_i32_0 = arith.constant 0 : i32
    %c0_i32_1 = arith.constant 0 : i32
    return %c0_i32, %c0_i32_0 : i32, i32
  }
  func.func @transform_3(%arg0: i32) -> (i32, i32) {
    %c0_i32 = arith.constant 0 : i32
    %c0_i32_0 = arith.constant 0 : i32
    %c0_i32_1 = arith.constant 0 : i32
    return %c0_i32, %c0_i32_0 : i32, i32
  }
  func.func @transform_4(%arg0: i32) -> (i32, i32) {
    %c0_i32 = arith.constant 0 : i32
    %c0_i32_0 = arith.constant 0 : i32
    %c0_i32_1 = arith.constant 0 : i32
    return %c0_i32, %c0_i32_0 : i32, i32
  }
  func.func @transform_5(%arg0: i32) -> (i32, i32) {
    %c0_i32 = arith.constant 0 : i32
    %c0_i32_0 = arith.constant 0 : i32
    %c0_i32_1 = arith.constant 0 : i32
    return %c0_i32, %c0_i32_0 : i32, i32
  }
  func.func @transform_6(%arg0: i32) -> (i32, i32) {
    %c0_i32 = arith.constant 0 : i32
    %c0_i32_0 = arith.constant 0 : i32
    %c0_i32_1 = arith.constant 0 : i32
    return %c0_i32, %c0_i32_0 : i32, i32
  }
  func.func @transform_7(%arg0: i32) -> (i32, i32) {
    %c0_i32 = arith.constant 0 : i32
    %c0_i32_0 = arith.constant 0 : i32
    %c0_i32_1 = arith.constant 0 : i32
    return %c0_i32, %c0_i32_0 : i32, i32
  }
  func.func @transform_8(%arg0: i32) -> (i32, i32) {
    %c0_i32 = arith.constant 0 : i32
    %c0_i32_0 = arith.constant 0 : i32
    %c0_i32_1 = arith.constant 0 : i32
    return %c0_i32, %c0_i32_0 : i32, i32
  }
  func.func @transform_9(%arg0: i32) -> (i32, i32) {
    %c0_i32 = arith.constant 0 : i32
    %c0_i32_0 = arith.constant 0 : i32
    return %c0_i32, %arg0 : i32, i32
  }
}

</mosaic_0001>

<bundles_post_ra>
// kernel: mlp_forward.1
= control target key start
LH: loop header
LB: loop body
LE: loop exit
PB: predicated region body
PF: predicated region fallthrough
CT: control target
= control target key end

     0   :  { %14 = vsyncpa [#allocation3], 0  ;;  %s700_s0 = inlined_call_operand.vmem [shape: f32[8,32], index: 0, kind: input, shape index: {}]   ;;  %s701_s1 = inlined_call_operand.hbm [shape: bf16[32,128], index: 1, kind: input, shape index: {}]   ;;  %s702_s2 = inlined_call_operand.vmem [shape: f32[1,128], index: 2, kind: input, shape index: {}]   ;;  %s703_s3 = inlined_call_operand.hbm [shape: bf16[128,128], index: 3, kind: input, shape index: {}]   ;;  %s704_s4 = inlined_call_operand.hbm [shape: f32[1,128], index: 4, kind: input, shape index: {}]   ;;  %s705_s5 = inlined_call_operand.hbm [shape: bf16[128,128], index: 5, kind: input, shape index: {}]   ;;  %s706_s6 = inlined_call_operand.hbm [shape: f32[1,128], index: 6, kind: input, shape index: {}]   ;;  %s707_s7 = inlined_call_operand.vmem [shape: bf16[8,128], index: 7, kind: input, shape index: {}]   ;;  %s708_s8 = inlined_call_operand.vmem [shape: f32[8,1], index: 8, kind: input, shape index: {}]   ;;  %s709_s9 = inlined_call_operand.vmem [shape: f32[8,8], index: 9, kind: output, shape index: {}]  }
   0x1   :  { %15 = vsyncpa [#allocation5], 0 }
   0x2   :  { %16 = vsyncpa [#allocation8], 0  ;;  %s38_s11 = sshll.u32 %s703_s3, 4  ;;  %s612_s12 = smov [#allocation4]   ;;  %s39_s11 = int_to_ptr.hbm [resolvable:$true] %s38_s11 }
   0x3   :  { %s40_s13 = sshll.u32 %s612_s12, 4  ;;  %s62_s16 = sshll.u32 %s705_s5, 4  ;;  %s41_s13 = int_to_ptr.vmem [resolvable:$true] %s40_s13  ;;  %s63_s16 = int_to_ptr.hbm [resolvable:$true] %s62_s16 }
   0x4   :  { %s613_s17 = smov 64   ;;  %s614_s18 = smov 4  }
   0x5   :  { %46 = dma.hbm_to_vmem [thread:$0]  %s39_s11, 1024, %s41_s13, [#allocation5], %s613_s17, %s613_s17, %s614_s18  }
   0x6   :  { %s615_s19 = smov [#allocation7]   ;;  %s23_s23 = sshll.u32 %s701_s1, 4  ;;  %s24_s23 = int_to_ptr.hbm [resolvable:$true] %s23_s23 }
   0x7   :  { %s64_s20 = sshll.u32 %s615_s19, 4  ;;  %s52_s25 = sshll.u32 %s704_s4, 4  ;;  %s65_s20 = int_to_ptr.vmem [resolvable:$true] %s64_s20  ;;  %s53_s25 = int_to_ptr.hbm [resolvable:$true] %s52_s25 }
   0x8   :  { %70 = dma.hbm_to_vmem [thread:$0]  %s63_s16, 1024, %s65_s20, [#allocation8], %s613_s17, %s613_s17, %s614_s18  }
   0x9   :  { %s616_s26 = smov [#allocation2]   ;;  %s617_s5 = smov [#allocation6]  }
   0xa   :  { %s25_s27 = sshll.u32 %s616_s26, 4  ;;  %s54_s28 = sshll.u32 %s617_s5, 4  ;;  %s26_s27 = int_to_ptr.vmem [resolvable:$true] %s25_s27  ;;  %s55_s28 = int_to_ptr.vmem [resolvable:$true] %s54_s28 }
   0xb   :  { %31 = dma.hbm_to_vmem [thread:$0]  %s24_s23, 256, %s26_s27, [#allocation3], %s613_s17, %s613_s17, %s614_s18  }
   0xc   :  { %s76_s10 = sshll.u32 %s706_s6, 4  ;;  %s618_s1 = smov [#allocation9]   ;;  %s77_s10 = int_to_ptr.hbm [resolvable:$true] %s76_s10 }
   0xd   :  { %57 = dma.hbm_to_vmem [thread:$0]  %s53_s25, 16, %s55_s28, [#allocation5]  }
   0xe   :  { %s78_s11 = sshll.u32 %s618_s1, 4  ;;  %s79_s11 = int_to_ptr.vmem [resolvable:$true] %s78_s11 }
   0xf   :  { %81 = dma.hbm_to_vmem [thread:$0]  %s77_s10, 16, %s79_s11, [#allocation8]  }
  0x10   :  { %606 = dma.done.wait [#allocation3], 256  }
  0x11   :  { %607 = vsyncadd [#allocation3], 4294967040 }
  0x12   :  { %608 = dma.done.wait [#allocation5], 1040  }
  0x13   :  { %609 = vsyncadd [#allocation5], 4294966256 }
  0x14   :  { %610 = dma.done.wait [#allocation8], 1040  }
  0x15   :  { %611 = vsyncadd [#allocation8], 4294966256  ;;  %v456_v0 = vld [vmem:[#allocation2 + $0x8] sm:$0xff]  ;;  %v455_v2 = vld [vmem:[#allocation2] sm:$0xff]  ;;  %vm129_vm0 = vcmask 261120   ;;  %v619_v59 = vmov 0  }
  0x16   :  { %v464_v1 = vld [vmem:[#allocation4 + $0x38] sm:$0xff]  ;;  %139 = vmatpush.bf16.msra.mxu0 %v456_v0  ;;  %v107_v3 = vld [vmem:[%s700_s0] sm:$0xff]  ;;  %v462_v6 = vld [vmem:[#allocation4 + $0x28] sm:$0xff]  ;;  %vm373_vm1 = vcmask 64512  }
  0x17   :  { %216 = vmatpush.bf16.msra.mxu1 %v464_v1  ;;  %v463_v4 = vld [vmem:[#allocation4 + $0x30] sm:$0xff]  ;;  %v108_v5 = vpack.c.bf16 %v107_v3, %v107_v3  ;;  %v461_v7 = vld [vmem:[#allocation4 + $0x20] sm:$0xff]  ;;  %v460_v8 = vld [vmem:[#allocation4 + $0x18] sm:$0xff] }
  0x18   :  { %v459_v9 = vld [vmem:[#allocation4 + $0x10] sm:$0xff]  ;;  %v458_v10 = vld [vmem:[#allocation4 + $0x8] sm:$0xff]  ;;  %v457_v11 = vld [vmem:[#allocation4] sm:$0xff] }
  0x19   :  { %v472_v12 = vld [vmem:[#allocation7 + $0x38] sm:$0xff]  ;;  %v471_v13 = vld [vmem:[#allocation7 + $0x30] sm:$0xff]  ;;  %v470_v14 = vld [vmem:[#allocation7 + $0x28] sm:$0xff] }
  0x1a   :  { %140 = vmatpush.bf16.msra.mxu0 %v455_v2  ;;  %299 = vmatpush.bf16.msra.mxu2 %v472_v12  ;;  %v469_v15 = vld [vmem:[#allocation7 + $0x20] sm:$0xff]  ;;  %v468_v16 = vld [vmem:[#allocation7 + $0x18] sm:$0xff]  ;;  %v467_v17 = vld [vmem:[#allocation7 + $0x10] sm:$0xff] }
  0x1b   :  { %217 = vmatpush.bf16.msra.mxu1 %v463_v4  ;;  %v483_v18 = vld [vmem:[%s702_s2] ss:$0 sm:$0xff]  ;;  %v465_v25 = vld [vmem:[#allocation7] sm:$0xff]  ;;  %v484_v26 = vld [vmem:[#allocation6] ss:$0 sm:$0xff] }
  0x1c   :  { %v466_v24 = vld [vmem:[#allocation7 + $0x8] sm:$0xff]  ;;  %v485_v32 = vld [vmem:[#allocation9] ss:$0 sm:$0xff] }
  0x1d   :  { %390 = vmatmul.msk.bf16.vlgmr.msra.gmra.mxu0 %vm129_vm0, %v108_v5  ;;  %v354_v58 = vld [vmem:[%s708_s8] sm:$0xff] }
  0x1e   :  { %300 = vmatpush.bf16.msra.mxu2 %v471_v13  ;;  %v353_v63 = vld [vmem:[%s707_s7] sm:$0xf] }
  0x1f   :  { %218 = vmatpush.bf16.msra.mxu1 %v462_v6 }
  0x22   :  { %301 = vmatpush.bf16.msra.mxu2 %v470_v14 }
  0x23   :  { %219 = vmatpush.bf16.msra.mxu1 %v461_v7 }
  0x26   :  { %302 = vmatpush.bf16.msra.mxu2 %v469_v15 }
  0x27   :  { %220 = vmatpush.bf16.msra.mxu1 %v460_v8 }
  0x2a   :  { %303 = vmatpush.bf16.msra.mxu2 %v468_v16 }
  0x2b   :  { %221 = vmatpush.bf16.msra.mxu1 %v459_v9 }
  0x2e   :  { %304 = vmatpush.bf16.msra.mxu2 %v467_v17 }
  0x2f   :  { %222 = vmatpush.bf16.msra.mxu1 %v458_v10 }
  0x32   :  { %305 = vmatpush.bf16.msra.mxu2 %v466_v24 }
  0x33   :  { %223 = vmatpush.bf16.msra.mxu1 %v457_v11 }
  0x36   :  { %306 = vmatpush.bf16.msra.mxu2 %v465_v25 }
  0x9a   :  { %v142_v19 = vpop.f32.mrf.mxu0 }
  0x9b   :  { %v143_v20 = vadd.f32 %v483_v18, %v142_v19 }
  0x9d   :  { %v146_v21 = vmax.f32 %v143_v20, 0.0 }
  0x9f   :  { %v147_v22 = vpack.c.bf16 %v146_v21, %v146_v21 }
  0xa1   :  { %224 = vmatmul.bf16.vlgmr.msra.gmra.mxu1 %v147_v22 }
  0xa2   :  { %v144_v23 = vpop.f32.mrf.mxu0 }
 0x11e   :  { %v225_v27 = vpop.f32.mrf.mxu1 }
 0x11f   :  { %v226_v28 = vadd.f32 %v484_v26, %v225_v27 }
 0x121   :  { %v229_v29 = vmax.f32 %v226_v28, 0.0 }
 0x123   :  { %v230_v30 = vpack.c.bf16 %v229_v29, %v229_v29 }
 0x125   :  { %307 = vmatmul.bf16.vlgmr.msra.gmra.mxu2 %v230_v30 }
 0x126   :  { %v227_v31 = vpop.f32.mrf.mxu1 }
 0x1a8   :  { %v308_v33 = vpop.f32.mrf.mxu2 }
 0x1a9   :  { %v309_v34 = vadd.f32 %v485_v32, %v308_v33 }
 0x1ab   :  { %v312_v35 = vmax.f32 %v309_v34, 0.0 }
 0x1ad   :  { %313 = vxpose.xlu0.b32.start.end [1/1] (short) %v312_v35, 128 }
 0x1b0   :  { %v310_v36 = vpop.f32.mrf.mxu2 }
 0x214   :  { %482 = vset.pattern.permute.xlu0 %v619_v59 }
 0x251   :  { %v329_v37 = vpop.trf.xlu0 }
 0x259   :  { %v330_v38 = vpop.trf.xlu0 }
 0x25a   :  { %v345_v39 = vpack.c.bf16 %v330_v38, %v329_v37 }
 0x261   :  { %v331_v40 = vpop.trf.xlu0 }
 0x269   :  { %v332_v41 = vpop.trf.xlu0 }
 0x26a   :  { %v346_v42 = vpack.c.bf16 %v332_v41, %v331_v40 }
 0x271   :  { %v333_v43 = vpop.trf.xlu0 }
 0x279   :  { %v334_v44 = vpop.trf.xlu0 }
 0x27a   :  { %v347_v45 = vpack.c.bf16 %v334_v44, %v333_v43 }
 0x281   :  { %v335_v46 = vpop.trf.xlu0 }
 0x289   :  { %v336_v47 = vpop.trf.xlu0 }
 0x28a   :  { %v348_v48 = vpack.c.bf16 %v336_v47, %v335_v46 }
 0x291   :  { %v337_v49 = vpop.trf.xlu0 }
 0x293   :  { %357 = vperm.xlu0 %482, %v354_v58  }
 0x299   :  { %v338_v50 = vpop.trf.xlu0 }
 0x29a   :  { %v349_v62 = vpack.c.bf16 %v338_v50, %v337_v49 }
 0x2a1   :  { %v339_v51 = vpop.trf.xlu0 }
 0x2a9   :  { %v340_v52 = vpop.trf.xlu0 }
 0x2aa   :  { %v350_v61 = vpack.c.bf16 %v340_v52, %v339_v51 }
 0x2b1   :  { %v341_v53 = vpop.trf.xlu0 }
 0x2b9   :  { %v342_v54 = vpop.trf.xlu0 }
 0x2ba   :  { %v351_v60 = vpack.c.bf16 %v342_v54, %v341_v53 }
 0x2c1   :  { %v343_v55 = vpop.trf.xlu0 }
 0x2c9   :  { %v344_v56 = vpop.trf.xlu0 }
 0x2ca   :  { %v352_v57 = vpack.c.bf16 %v344_v56, %v343_v55 }
 0x2cc   :  { %360 = vmatpush.bf16.msra.mxu3 %v352_v57 }
 0x2d0   :  { %361 = vmatpush.bf16.msra.mxu3 %v351_v60 }
 0x2d4   :  { %362 = vmatpush.bf16.msra.mxu3 %v350_v61 }
 0x2d8   :  { %363 = vmatpush.bf16.msra.mxu3 %v349_v62 }
 0x2dc   :  { %364 = vmatpush.bf16.msra.mxu3 %v348_v48 }
 0x2e0   :  { %365 = vmatpush.bf16.msra.mxu3 %v347_v45 }
 0x2e4   :  { %366 = vmatpush.bf16.msra.mxu3 %v346_v42 }
 0x2e8   :  { %367 = vmatpush.bf16.msra.mxu3 %v345_v39 }
 0x2eb   :  { %368 = vmatmul.bf16.vlgmr.msra.gmra.mxu3 %v353_v63 }
 0x305   :  { %v358_v0 = vpop.permute.xlu0 %357 }
 0x36e   :  { %v369_v1 = vpop.f32.mrf.mxu3 }
 0x36f   :  { %v370_v2 = vadd.f32 %v369_v1, %v358_v0 }
 0x371   :  { %374 = vst.msk [vmem:[%s709_s9] sm:$0xff] %vm373_vm1, %v370_v2 }
 0x376   :  { %v371_v3 = vpop.f32.mrf.mxu3 }
 0x377   :  { %379 = vsyncpa [#allocation3], 1 }
 0x378   :  { %380 = vsyncpa [#allocation5], 1 }
 0x379   :  { %381 = vsyncpa [#allocation8], 1 }

</bundles_post_ra>
